<compile_context>
chip_gen: v6e
topology: v6e:2x2x1
jax: 0.10.0
libtpu: 0.0.40
codegen_flags: <defaults>
</compile_context>

<pallas_src>
import jax
import jax.numpy as jnp
from jax.experimental import pallas as pl
from jax.experimental.pallas import tpu as pltpu


def _round_up(n, m):
    return ((n + m - 1) // m) * m


def net_kernel(x_ref, w1_ref, b1_ref, w2_ref, b2_ref, w3_ref, b3_ref, out_ref):
    # fc1 + relu : bf16 operands on the MXU, f32 accumulation, f32 elementwise.
    h1 = jnp.dot(x_ref[...], w1_ref[...], preferred_element_type=jnp.float32)
    h1 = jnp.maximum(h1 + b1_ref[...], 0.0).astype(jnp.bfloat16)

    # fc2 + relu
    h2 = jnp.dot(h1, w2_ref[...], preferred_element_type=jnp.float32)
    h2 = jnp.maximum(h2 + b2_ref[...], 0.0).astype(jnp.bfloat16)

    # fc3 : pad class columns have zero weights and a -1e30 bias, so they never
    # win the max and contribute exp(..) == 0 to the sum below.
    logits = jnp.dot(h2, w3_ref[...], preferred_element_type=jnp.float32) + b3_ref[...]

    # log_softmax over the class axis (lane axis, padded to 128 -> full-lane
    # reductions and an unmasked store).
    m = jnp.max(logits, axis=-1, keepdims=True)
    shifted = logits - m
    lse = jnp.log(jnp.sum(jnp.exp(shifted), axis=-1, keepdims=True))
    out_ref[...] = shifted - lse


def _resident_spec(shape):
    """Grid-invariant (weight/bias) block: constant index_map, single-buffered.

    Default pipelining double-buffers every input; for blocks that are never
    re-fetched across grid steps that is pure VMEM waste. Fall back silently if
    the installed JAX does not support pipeline_mode.
    """
    try:
        return pl.BlockSpec(shape, lambda i: (0, 0), pipeline_mode=pl.Buffered(1))
    except (AttributeError, TypeError):
        return pl.BlockSpec(shape, lambda i: (0, 0))


def preprocess_params(params):
    """One-time parameter prep (do NOT call per forward):
    transpose to [in, out], zero-pad to lane-dense multiples of 128, cast
    weights to bf16, keep biases in f32 (pad classes get a -1e30 bias)."""
    w1, b1 = params["w1"], params["b1"]
    w2, b2 = params["w2"], params["b2"]
    w3, b3 = params["w3"], params["b3"]

    F = w1.shape[1]
    H = w1.shape[0]
    C = w3.shape[0]
    Fp, Hp, Cp = _round_up(F, 128), _round_up(H, 128), _round_up(C, 128)

    def pad2(a, rows, cols):
        return jnp.pad(a, ((0, rows - a.shape[0]), (0, cols - a.shape[1])))

    return {
        "w1t": pad2(w1.T, Fp, Hp).astype(jnp.bfloat16),
        "w2t": pad2(w2.T, Hp, Hp).astype(jnp.bfloat16),
        "w3t": pad2(w3.T, Hp, Cp).astype(jnp.bfloat16),
        "b1": jnp.pad(b1, (0, Hp - H))[None, :].astype(jnp.float32),
        "b2": jnp.pad(b2, (0, Hp - H))[None, :].astype(jnp.float32),
        "b3": jnp.pad(b3, (0, Cp - C), constant_values=-1e30)[None, :].astype(jnp.float32),
        "dims": (F, H, C, Fp, Hp, Cp),
    }


def net_forward(x, prepped, *, tb_max=512):
    """x: [B, input_size] float32.  prepped: output of preprocess_params."""
    F, H, C, Fp, Hp, Cp = prepped["dims"]
    B = x.shape[0]
    assert x.shape[1] == F, "input feature dim does not match fc1"

    # --- Balanced batch tiling ---------------------------------------------
    # Pad rows to a multiple of 8 (sublane), then split into just enough tiles
    # that each tile is <= tb_max rows: padding waste is at most 7 rows instead
    # of up to TB-1.  For medium/large batches force >= 2 grid steps so both
    # v7x TensorCores get work (harmless serial steps on v5e/v6e).
    B8 = _round_up(max(B, 8), 8)
    n_tiles = max(pl.cdiv(B8, tb_max), 1)
    if n_tiles < 2 and B8 >= 256:
        n_tiles = 2
    TB = _round_up(pl.cdiv(B8, n_tiles), 8)
    Bp = TB * n_tiles

    # Zero-pad x (padded rows/cols contribute nothing) and stream as bf16.
    xp = jnp.pad(x, ((0, Bp - B), (0, Fp - F))).astype(jnp.bfloat16)

    # --- VMEM budget ---------------------------------------------------------
    # single-buffered weights + double-buffered x/out tiles + f32/bf16 temps,
    # with 2x headroom; clamp to [32 MiB, 48 MiB] (fits v7x's 64 MiB physical,
    # overrides v5e's 16 MiB scoped default).
    weight_bytes = 2 * (Fp * Hp + Hp * Hp + Hp * Cp) + 4 * (2 * Hp + Cp)
    stream_bytes = 2 * (2 * TB * Fp) + 2 * (4 * TB * Cp)
    temp_bytes = 2 * (4 * TB * Hp) + 2 * (2 * TB * Hp) + 4 * TB * Cp
    vmem_limit = int(min(48 << 20, max(32 << 20, 2 * (weight_bytes + stream_bytes + temp_bytes))))

    out_padded = pl.pallas_call(
        net_kernel,
        out_shape=jax.ShapeDtypeStruct((Bp, Cp), jnp.float32),
        grid_spec=pl.GridSpec(
            grid=(n_tiles,),
            in_specs=[
                pl.BlockSpec((TB, Fp), lambda i: (i, 0)),  # x: tiled over batch
                _resident_spec((Fp, Hp)),                  # weights/biases: resident,
                _resident_spec((1, Hp)),                   # single-buffered
                _resident_spec((Hp, Hp)),
                _resident_spec((1, Hp)),
                _resident_spec((Hp, Cp)),
                _resident_spec((1, Cp)),
            ],
            out_specs=pl.BlockSpec((TB, Cp), lambda i: (i, 0)),
        ),
        compiler_params=pltpu.CompilerParams(
            dimension_semantics=("parallel",),
            vmem_limit_bytes=vmem_limit,
        ),
    )(xp, prepped["w1t"], prepped["b1"], prepped["w2t"], prepped["b2"],
      prepped["w3t"], prepped["b3"])

    # Carve the logical (B, C) result out of the lane-padded slab.
    return out_padded[:B, :C]


def init_params(key, input_size, hidden_size, output_size):
    """Deterministic synthetic parameter init (PyTorch Linear shape convention)."""
    ks = jax.random.split(key, 6)

    def lin(kw, kb, fan_in, fan_out):
        bound = 1.0 / jnp.sqrt(fan_in)
        w = jax.random.uniform(kw, (fan_out, fan_in), jnp.float32, -bound, bound)
        b = jax.random.uniform(kb, (fan_out,), jnp.float32, -bound, bound)
        return w, b

    w1, b1 = lin(ks[0], ks[1], input_size, hidden_size)
    w2, b2 = lin(ks[2], ks[3], hidden_size, hidden_size)
    w3, b3 = lin(ks[4], ks[5], hidden_size, output_size)
    return {"w1": w1, "b1": b1, "w2": w2, "b2": b2, "w3": w3, "b3": b3}


if __name__ == "__main__":
    # Small shapes consistent with the module (original: input=1500, hidden=1000,
    # out=#categories). Deliberately non-multiples of 128 / 8 to exercise the
    # padding paths (batch 10->16, 250->256, 120->128, 7->128).
    batch = 10
    input_size = 250
    hidden_size = 120
    output_size = 7

    key = jax.random.PRNGKey(0)
    kx, kp = jax.random.split(key)
    x = jax.random.normal(kx, (batch, input_size), jnp.float32)
    params = init_params(kp, input_size, hidden_size, output_size)

    # One-time parameter preprocessing (hoisted out of the per-call path).
    prepped = preprocess_params(params)
    prepped = jax.tree_util.tree_map(
        lambda a: jax.block_until_ready(a) if isinstance(a, jax.Array) else a, prepped
    )

    out = net_forward(x, prepped)
    out = jax.block_until_ready(out)

    # Reference check in plain JAX (full f32 math). bf16 matmul operands in the
    # kernel => loosened tolerance (inference-grade accuracy).
    h1 = jnp.maximum(x @ params["w1"].T + params["b1"], 0.0)
    h2 = jnp.maximum(h1 @ params["w2"].T + params["b2"], 0.0)
    logits = h2 @ params["w3"].T + params["b3"]
    ref = jax.nn.log_softmax(logits, axis=1)

    assert out.shape == (batch, output_size)
    assert jnp.allclose(out, ref, atol=5e-2, rtol=5e-2)

    print("KERNEL_OK")
</pallas_src>

<mosaic_0001>
module attributes {stable_mosaic.version = 11 : i64} {
  func.func @net_kernel(%arg0: i32, %arg1: memref<16x256xbf16, #tpu.memory_space<vmem>>, %arg2: memref<256x128xbf16, #tpu.memory_space<vmem>>, %arg3: memref<1x128xf32, #tpu.memory_space<vmem>>, %arg4: memref<128x128xbf16, #tpu.memory_space<vmem>>, %arg5: memref<1x128xf32, #tpu.memory_space<vmem>>, %arg6: memref<128x128xbf16, #tpu.memory_space<vmem>>, %arg7: memref<1x128xf32, #tpu.memory_space<vmem>>, %arg8: memref<16x128xf32, #tpu.memory_space<vmem>>) attributes {dimension_semantics = [#tpu.dimension_semantics<parallel>], iteration_bounds = array<i64: 1>, scalar_prefetch = 0 : i64, scratch_operands = 0 : i64, tpu.core_type = #tpu.core_type<tc>, window_params = [{transform_indices = @transform_0, window_bounds = array<i64: 16, 256>}, {pipeline_mode = #tpu.pipeline_mode<synchronous>, transform_indices = @transform_1, window_bounds = array<i64: 256, 128>}, {pipeline_mode = #tpu.pipeline_mode<synchronous>, transform_indices = @transform_2, window_bounds = array<i64: 1, 128>}, {pipeline_mode = #tpu.pipeline_mode<synchronous>, transform_indices = @transform_3, window_bounds = array<i64: 128, 128>}, {pipeline_mode = #tpu.pipeline_mode<synchronous>, transform_indices = @transform_4, window_bounds = array<i64: 1, 128>}, {pipeline_mode = #tpu.pipeline_mode<synchronous>, transform_indices = @transform_5, window_bounds = array<i64: 128, 128>}, {pipeline_mode = #tpu.pipeline_mode<synchronous>, transform_indices = @transform_6, window_bounds = array<i64: 1, 128>}, {transform_indices = @transform_7, window_bounds = array<i64: 16, 128>}]} {
    %c0 = arith.constant 0 : index
    %c0_0 = arith.constant 0 : index
    %0 = vector.load %arg1[%c0, %c0_0] : memref<16x256xbf16, #tpu.memory_space<vmem>>, vector<16x256xbf16>
    %c0_1 = arith.constant 0 : index
    %c0_2 = arith.constant 0 : index
    %1 = vector.load %arg2[%c0_1, %c0_2] : memref<256x128xbf16, #tpu.memory_space<vmem>>, vector<256x128xbf16>
    %cst = arith.constant dense<0.000000e+00> : vector<16x128xf32>
    %2 = tpu.matmul %0, %1, %cst {dimension_numbers = #tpu.dot_dimension_numbers<[1], [0], [0], [1], [0, 0, 1, 1], [], []>} : vector<16x256xbf16>, vector<256x128xbf16>, vector<16x128xf32> -> vector<16x128xf32>
    %c0_3 = arith.constant 0 : index
    %c0_4 = arith.constant 0 : index
    %3 = vector.load %arg3[%c0_3, %c0_4] : memref<1x128xf32, #tpu.memory_space<vmem>>, vector<1x128xf32>
    %4 = vector.broadcast %3 : vector<1x128xf32> to vector<16x128xf32>
    %5 = arith.addf %2, %4 : vector<16x128xf32>
    %cst_5 = arith.constant 0.000000e+00 : f32
    %6 = vector.broadcast %cst_5 : f32 to vector<16x128xf32>
    %7 = arith.maximumf %5, %6 : vector<16x128xf32>
    %8 = arith.truncf %7 : vector<16x128xf32> to vector<16x128xbf16>
    %c0_6 = arith.constant 0 : index
    %c0_7 = arith.constant 0 : index
    %9 = vector.load %arg4[%c0_6, %c0_7] : memref<128x128xbf16, #tpu.memory_space<vmem>>, vector<128x128xbf16>
    %cst_8 = arith.constant dense<0.000000e+00> : vector<16x128xf32>
    %10 = tpu.matmul %8, %9, %cst_8 {dimension_numbers = #tpu.dot_dimension_numbers<[1], [0], [0], [1], [0, 0, 1, 1], [], []>} : vector<16x128xbf16>, vector<128x128xbf16>, vector<16x128xf32> -> vector<16x128xf32>
    %c0_9 = arith.constant 0 : index
    %c0_10 = arith.constant 0 : index
    %11 = vector.load %arg5[%c0_9, %c0_10] : memref<1x128xf32, #tpu.memory_space<vmem>>, vector<1x128xf32>
    %12 = vector.broadcast %11 : vector<1x128xf32> to vector<16x128xf32>
    %13 = arith.addf %10, %12 : vector<16x128xf32>
    %cst_11 = arith.constant 0.000000e+00 : f32
    %14 = vector.broadcast %cst_11 : f32 to vector<16x128xf32>
    %15 = arith.maximumf %13, %14 : vector<16x128xf32>
    %16 = arith.truncf %15 : vector<16x128xf32> to vector<16x128xbf16>
    %c0_12 = arith.constant 0 : index
    %c0_13 = arith.constant 0 : index
    %17 = vector.load %arg6[%c0_12, %c0_13] : memref<128x128xbf16, #tpu.memory_space<vmem>>, vector<128x128xbf16>
    %cst_14 = arith.constant dense<0.000000e+00> : vector<16x128xf32>
    %18 = tpu.matmul %16, %17, %cst_14 {dimension_numbers = #tpu.dot_dimension_numbers<[1], [0], [0], [1], [0, 0, 1, 1], [], []>} : vector<16x128xbf16>, vector<128x128xbf16>, vector<16x128xf32> -> vector<16x128xf32>
    %c0_15 = arith.constant 0 : index
    %c0_16 = arith.constant 0 : index
    %19 = vector.load %arg7[%c0_15, %c0_16] : memref<1x128xf32, #tpu.memory_space<vmem>>, vector<1x128xf32>
    %20 = vector.broadcast %19 : vector<1x128xf32> to vector<16x128xf32>
    %21 = arith.addf %18, %20 : vector<16x128xf32>
    %cst_17 = arith.constant dense<0xFF800000> : vector<16xf32>
    %22 = vector.multi_reduction <maximumf>, %21, %cst_17 [1] : vector<16x128xf32> to vector<16xf32>
    %23 = vector.shape_cast %22 : vector<16xf32> to vector<16x1xf32>
    %24 = vector.broadcast %23 : vector<16x1xf32> to vector<16x128xf32>
    %25 = arith.subf %21, %24 : vector<16x128xf32>
    %26 = math.exp %25 : vector<16x128xf32>
    %cst_18 = arith.constant dense<0.000000e+00> : vector<16xf32>
    %27 = vector.multi_reduction <add>, %26, %cst_18 [1] : vector<16x128xf32> to vector<16xf32>
    %28 = vector.shape_cast %27 : vector<16xf32> to vector<16x1xf32>
    %29 = math.log %28 : vector<16x1xf32>
    %30 = vector.broadcast %29 : vector<16x1xf32> to vector<16x128xf32>
    %31 = arith.subf %25, %30 : vector<16x128xf32>
    %c0_19 = arith.constant 0 : index
    %c0_20 = arith.constant 0 : index
    %32 = vector.load %arg8[%c0_19, %c0_20] : memref<16x128xf32, #tpu.memory_space<vmem>>, vector<16x128xf32>
    tpu.vector_store %arg8[%c0_19, %c0_20], %31 {strides = array<i32>} : memref<16x128xf32, #tpu.memory_space<vmem>>, vector<16x128xf32>,
    return
  }
  func.func @transform_0(%arg0: i32) -> (i32, i32) {
    %c0_i32 = arith.constant 0 : i32
    %c0_i32_0 = arith.constant 0 : i32
    return %arg0, %c0_i32 : i32, i32
  }
  func.func @transform_1(%arg0: i32) -> (i32, i32) {
    %c0_i32 = arith.constant 0 : i32
    %c0_i32_0 = arith.constant 0 : i32
    %c0_i32_1 = arith.constant 0 : i32
    return %c0_i32, %c0_i32_0 : i32, i32
  }
  func.func @transform_2(%arg0: i32) -> (i32, i32) {
    %c0_i32 = arith.constant 0 : i32
    %c0_i32_0 = arith.constant 0 : i32
    %c0_i32_1 = arith.constant 0 : i32
    return %c0_i32, %c0_i32_0 : i32, i32
  }
  func.func @transform_3(%arg0: i32) -> (i32, i32) {
    %c0_i32 = arith.constant 0 : i32
    %c0_i32_0 = arith.constant 0 : i32
    %c0_i32_1 = arith.constant 0 : i32
    return %c0_i32, %c0_i32_0 : i32, i32
  }
  func.func @transform_4(%arg0: i32) -> (i32, i32) {
    %c0_i32 = arith.constant 0 : i32
    %c0_i32_0 = arith.constant 0 : i32
    %c0_i32_1 = arith.constant 0 : i32
    return %c0_i32, %c0_i32_0 : i32, i32
  }
  func.func @transform_5(%arg0: i32) -> (i32, i32) {
    %c0_i32 = arith.constant 0 : i32
    %c0_i32_0 = arith.constant 0 : i32
    %c0_i32_1 = arith.constant 0 : i32
    return %c0_i32, %c0_i32_0 : i32, i32
  }
  func.func @transform_6(%arg0: i32) -> (i32, i32) {
    %c0_i32 = arith.constant 0 : i32
    %c0_i32_0 = arith.constant 0 : i32
    %c0_i32_1 = arith.constant 0 : i32
    return %c0_i32, %c0_i32_0 : i32, i32
  }
  func.func @transform_7(%arg0: i32) -> (i32, i32) {
    %c0_i32 = arith.constant 0 : i32
    %c0_i32_0 = arith.constant 0 : i32
    return %arg0, %c0_i32 : i32, i32
  }
}

</mosaic_0001>

<bundles_post_ra>
// kernel: tpu_custom_call.1
= control target key start
LH: loop header
LB: loop body
LE: loop exit
PB: predicated region body
PF: predicated region fallthrough
CT: control target
= control target key end

     0   :  { %12 = vsyncpa [#allocation3], 0  ;;  %s929_s0 = inlined_call_operand.hbm [shape: bf16[16,256], index: 0, kind: input, shape index: {}]   ;;  %s930_s1 = inlined_call_operand.hbm [shape: bf16[256,128], index: 1, kind: input, shape index: {}]   ;;  %s931_s2 = inlined_call_operand.vmem [shape: f32[1,128], index: 2, kind: input, shape index: {}]   ;;  %s932_s3 = inlined_call_operand.hbm [shape: bf16[128,128], index: 3, kind: input, shape index: {}]   ;;  %s933_s4 = inlined_call_operand.vmem [shape: f32[1,128], index: 4, kind: input, shape index: {}]   ;;  %s934_s5 = inlined_call_operand.hbm [shape: bf16[128,128], index: 5, kind: input, shape index: {}]   ;;  %s935_s6 = inlined_call_operand.vmem [shape: f32[1,128], index: 6, kind: input, shape index: {}]   ;;  %s936_s7 = inlined_call_operand.hbm [shape: f32[16,128], index: 7, kind: output, shape index: {}]  }
   0x1   :  { %13 = vsyncpa [#allocation6], 0 }
   0x2   :  { %14 = vsyncpa [#allocation9], 0 }
   0x3   :  { %15 = vsyncpa [#allocation4], 0  ;;  %s821_s24 = smov [#allocation5]  }
   0x4   :  { %s33_s25 = sshll.u32 %s821_s24, 4  ;;  %s34_s25 = int_to_ptr.vmem [resolvable:$true] %s33_s25 }
   0x5   :  { %s721_s26 = scalar_lea.vmem %s34_s25, 2048  ;;  %p726_p1 = scmp.lt.s32.totalorder %s34_s25, %s34_s25 }
   0x6   :  { %p722_p0 = scmp.ne.s32.totalorder %s34_s25, %s721_s26  ;;  %p727_p2 = scmp.lt.s32.totalorder %s721_s26, %s721_s26 }
   0x8   :  { %p728_p3 = por %p727_p2, %p726_p1 }
   0xa   :  { %p729_p4 = pnand %p728_p3, %p722_p0 }
   0xc   :  { %732 = shalt.err (!%p729_p4)
}
   0xd   :  { %s822_s27 = smov 64   ;;  %s823_s28 = smov 4  }
   0xe   :  { %39 = dma.hbm_to_vmem [thread:$0]  %s930_s1, 2048, %s34_s25, [#allocation6], %s822_s27, %s822_s27, %s823_s28  }
   0xf   :  { %s824_s8 = smov [#allocation2]  }
  0x10   :  { %s21_s9 = sshll.u32 %s824_s8, 4  ;;  %s22_s9 = int_to_ptr.vmem [resolvable:$true] %s21_s9 }
  0x11   :  { %s741_s10 = scalar_lea.vmem %s22_s9, 256  ;;  %p746_p6 = scmp.lt.s32.totalorder %s22_s9, %s22_s9 }
  0x12   :  { %p742_p5 = scmp.ne.s32.totalorder %s22_s9, %s741_s10  ;;  %p747_p7 = scmp.lt.s32.totalorder %s741_s10, %s741_s10 }
  0x14   :  { %p748_p8 = por %p747_p7, %p746_p6 }
  0x16   :  { %p749_p9 = pnand %p748_p8, %p742_p5 }
  0x18   :  { %752 = shalt.err (!%p749_p9)
}
  0x19   :  { %s825_s11 = smov 128   ;;  %s826_s12 = smov 8  }
  0x1a   :  { %27 = dma.hbm_to_vmem [thread:$0]  %s929_s0, 256, %s22_s9, [#allocation3], %s825_s11, %s825_s11, %s826_s12  }
  0x1b   :  { %s827_s1 = smov [#allocation7]   ;;  %s828_s16 = smov [#allocation8]  }
  0x1c   :  { %s47_s15 = sshll.u32 %s827_s1, 4  ;;  %s61_s17 = sshll.u32 %s828_s16, 4  ;;  %s48_s15 = int_to_ptr.vmem [resolvable:$true] %s47_s15  ;;  %s62_s17 = int_to_ptr.vmem [resolvable:$true] %s61_s17 }
  0x1d   :  { %s761_s18 = scalar_lea.vmem %s48_s15, 1024  ;;  %p766_p11 = scmp.lt.s32.totalorder %s48_s15, %s48_s15 }
  0x1e   :  { %p762_p10 = scmp.ne.s32.totalorder %s48_s15, %s761_s18  ;;  %p767_p12 = scmp.lt.s32.totalorder %s761_s18, %s761_s18 }
  0x20   :  { %p768_p13 = por %p767_p12, %p766_p11 }
  0x22   :  { %p769_p0 = pnand %p768_p13, %p762_p10 }
  0x24   :  { %772 = shalt.err (!%p769_p0)
}
  0x25   :  { %53 = dma.hbm_to_vmem [thread:$0]  %s932_s3, 1024, %s48_s15, [#allocation6], %s822_s27, %s822_s27, %s823_s28  }
  0x26   :  { %s781_s0 = scalar_lea.vmem %s62_s17, 1024  ;;  %p786_p2 = scmp.lt.s32.totalorder %s62_s17, %s62_s17 }
  0x27   :  { %p782_p1 = scmp.ne.s32.totalorder %s62_s17, %s781_s0  ;;  %p787_p3 = scmp.lt.s32.totalorder %s781_s0, %s781_s0 }
  0x29   :  { %p788_p4 = por %p787_p3, %p786_p2 }
  0x2b   :  { %p789_p5 = pnand %p788_p4, %p782_p1 }
  0x2d   :  { %792 = shalt.err (!%p789_p5)
}
  0x2e   :  { %67 = dma.hbm_to_vmem [thread:$0]  %s934_s5, 1024, %s62_s17, [#allocation9], %s822_s27, %s822_s27, %s823_s28  }
  0x2f   :  { %813 = dma.done.wait [#allocation3], 256  }
  0x30   :  { %814 = vsyncadd [#allocation3], 4294967040 }
  0x31   :  { %815 = dma.done.wait [#allocation6], 3072  }
  0x32   :  { %816 = vsyncadd [#allocation6], 4294964224 }
  0x33   :  { %817 = dma.done.wait [#allocation9], 1024  }
  0x34   :  { %818 = vsyncadd [#allocation9], 4294966272  ;;  %v829_v0 = vmov 0.0   ;;  %v670_v1 = vld [vmem:[#allocation5 + $0x78] sm:$0xff]   ;;  %v672_v3 = vld [vmem:[#allocation5 + $0x70] sm:$0xff]   ;;  %vm830_vm0 = vmmov 0  }
  0x35   :  { %619 = vmatprep.subr.bf16.mxu1 %v829_v0  ;;  %v671_v2 = vld [vmem:[#allocation5 + $0x38] sm:$0xff]   ;;  %579 = vmatprep.subr.bf16.mxu0 %v670_v1  ;;  %v673_v4 = vld [vmem:[#allocation5 + $0x30] sm:$0xff]   ;;  %v674_v5 = vld [vmem:[#allocation5 + $0x68] sm:$0xff]  }
  0x36   :  { %580 = vmatpush3.bf16.msra.mxu0 %v671_v2  ;;  %v675_v6 = vld [vmem:[#allocation5 + $0x28] sm:$0xff]   ;;  %v676_v7 = vld [vmem:[#allocation5 + $0x60] sm:$0xff]   ;;  %v678_v9 = vld [vmem:[#allocation5 + $0x58] sm:$0xff]   ;;  %635 = vmatprep.mubr.msk.bf16.mxu1 %vm830_vm0, %v829_v0 }
  0x37   :  { %581 = vmatprep.subr.bf16.mxu0 %v672_v3  ;;  %v677_v8 = vld [vmem:[#allocation5 + $0x20] sm:$0xff]   ;;  %v679_v10 = vld [vmem:[#allocation5 + $0x18] sm:$0xff]   ;;  %v680_v11 = vld [vmem:[#allocation5 + $0x50] sm:$0xff]  }
  0x38   :  { %v681_v12 = vld [vmem:[#allocation5 + $0x10] sm:$0xff]   ;;  %v689_v14 = vld [vmem:[#allocation7 + $0x38] sm:$0xff]   ;;  %v682_v15 = vld [vmem:[#allocation5 + $0x48] sm:$0xff]  }
  0x39   :  { %v688_v13 = vld [vmem:[#allocation2 + $0x4] ss:$8 sps:$4 sm:$0xff]   ;;  %620 = vmatpush3.bf16.msra.mxu1 %v689_v14  ;;  %v683_v17 = vld [vmem:[#allocation5 + $0x8] sm:$0xff]   ;;  %v684_v18 = vld [vmem:[#allocation5 + $0x40] sm:$0xff]  }
  0x3a   :  { %582 = vmatpush3.bf16.msra.mxu0 %v673_v4  ;;  %262 = vmatprep.mubr.bf16.mxu0 %v688_v13  ;;  %v690_v16 = vld [vmem:[#allocation7 + $0x30] sm:$0xff]   ;;  %v691_v19 = vld [vmem:[#allocation7 + $0x28] sm:$0xff]   ;;  %v685_v20 = vld [vmem:[#allocation5] sm:$0xff]  }
  0x3b   :  { %583 = vmatprep.subr.bf16.mxu0 %v674_v5  ;;  %621 = vmatprep.subr.bf16.mxu1 %v829_v0  ;;  %v692_v21 = vld [vmem:[#allocation7 + $0x20] sm:$0xff]   ;;  %v686_v22 = vld [vmem:[#allocation2] ss:$8 sps:$4 sm:$0xff]   ;;  %v695_v25 = vld [vmem:[#allocation7 + $0x8] sm:$0xff]  }
  0x3c   :  { %v693_v23 = vld [vmem:[#allocation7 + $0x18] sm:$0xff]   ;;  %v694_v24 = vld [vmem:[#allocation7 + $0x10] sm:$0xff]   ;;  %v696_v26 = vld [vmem:[#allocation7] sm:$0xff]  }
  0x3d   :  { %622 = vmatpush3.bf16.msra.mxu1 %v690_v16  ;;  %v697_v27 = vld [vmem:[#allocation8 + $0x38] sm:$0xff]   ;;  %v698_v28 = vld [vmem:[#allocation8 + $0x30] sm:$0xff]   ;;  %v699_v29 = vld [vmem:[#allocation8 + $0x28] sm:$0xff]  }
  0x3e   :  { %584 = vmatpush3.bf16.msra.mxu0 %v675_v6  ;;  %623 = vmatprep.subr.bf16.mxu1 %v829_v0  ;;  %v700_v30 = vld [vmem:[#allocation8 + $0x20] sm:$0xff]   ;;  %v701_v31 = vld [vmem:[#allocation8 + $0x18] sm:$0xff]   ;;  %v542_v35 = vld [vmem:[%s931_s2] ss:$0 sm:$0xff] }
  0x3f   :  { %585 = vmatprep.subr.bf16.mxu0 %v676_v7  ;;  %v702_v44 = vld [vmem:[#allocation8 + $0x10] sm:$0xff]   ;;  %v703_v45 = vld [vmem:[#allocation8 + $0x8] sm:$0xff]   ;;  %v704_v46 = vld [vmem:[#allocation8] sm:$0xff]  }
  0x40   :  { %v561_v47 = vld [vmem:[%s933_s4] ss:$0 sm:$0xff]  ;;  %s831_s4 = smov [#allocation10]  }
  0x41   :  { %624 = vmatpush3.bf16.msra.mxu1 %v691_v19  ;;  %v570_v57 = vld [vmem:[%s935_s6] ss:$0 sm:$0xff]  ;;  %s528_s6 = sshll.u32 %s831_s4, 4  ;;  %s529_s6 = int_to_ptr.vmem [resolvable:$true] %s528_s6 }
  0x42   :  { %586 = vmatpush3.bf16.msra.mxu0 %v677_v8  ;;  %625 = vmatprep.subr.bf16.mxu1 %v829_v0  ;;  %s793_s26 = scalar_lea.vmem %s529_s6, 256  ;;  %p798_p7 = scmp.lt.s32.totalorder %s529_s6, %s529_s6 }
  0x43   :  { %587 = vmatprep.subr.bf16.mxu0 %v678_v9  ;;  %p794_p6 = scmp.ne.s32.totalorder %s529_s6, %s793_s26  ;;  %p799_p8 = scmp.lt.s32.totalorder %s793_s26, %s793_s26 }
  0x45   :  { %626 = vmatpush3.bf16.msra.mxu1 %v692_v21  ;;  %p800_p9 = por %p799_p8, %p798_p7 }
  0x46   :  { %588 = vmatpush3.bf16.msra.mxu0 %v679_v10  ;;  %627 = vmatprep.subr.bf16.mxu1 %v829_v0 }
  0x47   :  { %589 = vmatprep.subr.bf16.mxu0 %v680_v11  ;;  %p801_p10 = pnand %p800_p9, %p794_p6 }
  0x49   :  { %628 = vmatpush3.bf16.msra.mxu1 %v693_v23 }
  0x4a   :  { %590 = vmatpush3.bf16.msra.mxu0 %v681_v12  ;;  %629 = vmatprep.subr.bf16.mxu1 %v829_v0 }
  0x4b   :  { %591 = vmatprep.subr.bf16.mxu0 %v682_v15 }
  0x4d   :  { %630 = vmatpush3.bf16.msra.mxu1 %v694_v24 }
  0x4e   :  { %592 = vmatpush3.bf16.msra.mxu0 %v683_v17  ;;  %631 = vmatprep.subr.bf16.mxu1 %v829_v0 }
  0x4f   :  { %593 = vmatprep.subr.bf16.mxu0 %v684_v18 }
  0x51   :  { %632 = vmatpush3.bf16.msra.mxu1 %v695_v25 }
  0x52   :  { %594 = vmatpush3.bf16.msra.mxu0 %v685_v20  ;;  %633 = vmatprep.subr.bf16.mxu1 %v829_v0 }
  0x53   :  { %639 = vmatprep.subr.bf16.mxu0 %v829_v0 }
  0x55   :  { %263 = vmatmul.mubr.bf16.vlgmr.msra.gmra.mxu0 %v686_v22  ;;  %634 = vmatpush3.bf16.msra.mxu1 %v696_v26 }
  0x56   :  { %655 = vmatprep.mubr.msk.bf16.mxu0 %vm830_vm0, %v829_v0  ;;  %640 = vmatpush3.bf16.msra.mxu0 %v697_v27 }
  0x57   :  { %641 = vmatprep.subr.bf16.mxu0 %v829_v0 }
  0x5a   :  { %642 = vmatpush3.bf16.msra.mxu0 %v698_v28 }
  0x5b   :  { %643 = vmatprep.subr.bf16.mxu0 %v829_v0 }
  0x5e   :  { %644 = vmatpush3.bf16.msra.mxu0 %v699_v29 }
  0x5f   :  { %645 = vmatprep.subr.bf16.mxu0 %v829_v0 }
  0x62   :  { %646 = vmatpush3.bf16.msra.mxu0 %v700_v30 }
  0x63   :  { %647 = vmatprep.subr.bf16.mxu0 %v829_v0 }
  0x66   :  { %648 = vmatpush3.bf16.msra.mxu0 %v701_v31 }
  0x67   :  { %649 = vmatprep.subr.bf16.mxu0 %v829_v0 }
  0x6a   :  { %650 = vmatpush3.bf16.msra.mxu0 %v702_v44 }
  0x6b   :  { %651 = vmatprep.subr.bf16.mxu0 %v829_v0 }
  0x6e   :  { %652 = vmatpush3.bf16.msra.mxu0 %v703_v45 }
  0x6f   :  { %653 = vmatprep.subr.bf16.mxu0 %v829_v0 }
  0x72   :  { %654 = vmatpush3.bf16.msra.mxu0 %v704_v46 }
 0x115   :  { %v595_v32 = vpop.f32.mrf.mxu0 }
 0x117   :  { %v596_v33 = vpop.f32.mrf.mxu0 }
 0x118   :  { %v597_v34 = vadd.f32 %v596_v33, %v595_v32 }
 0x119   :  { %v598_v36 = vpop.f32.mrf.mxu0 }
 0x11a   :  { %v265_v38 = vadd.f32 %v597_v34, %v542_v35 }
 0x11b   :  { %v599_v37 = vpop.f32.mrf.mxu0 }
 0x11c   :  { %v600_v39 = vadd.f32 %v599_v37, %v598_v36  ;;  %v271_v41 = vmax.f32 %v265_v38, 0.0 }
 0x11e   :  { %v268_v40 = vadd.f32 %v600_v39, %v542_v35 }
 0x120   :  { %v272_v42 = vmax.f32 %v268_v40, 0.0 }
 0x122   :  { %v273_v43 = vpack.c.bf16 %v272_v42, %v271_v41 }
 0x124   :  { %636 = vmatmul.mubr.bf16.vlgmr.msra.gmra.mxu1 %v273_v43 }
 0x1e4   :  { %v379_v48 = vpop.f32.mrf.mxu1 }
 0x1e5   :  { %v380_v50 = vadd.f32 %v561_v47, %v379_v48 }
 0x1e6   :  { %v637_v49 = vpop.f32.mrf.mxu1 }
 0x1e7   :  { %v386_v54 = vmax.f32 %v380_v50, 0.0 }
 0x1e8   :  { %v382_v51 = vpop.f32.mrf.mxu1 }
 0x1e9   :  { %v383_v52 = vadd.f32 %v561_v47, %v382_v51 }
 0x1ea   :  { %v638_v53 = vpop.f32.mrf.mxu1 }
 0x1eb   :  { %v387_v55 = vmax.f32 %v383_v52, 0.0 }
 0x1ed   :  { %v388_v56 = vpack.c.bf16 %v387_v55, %v386_v54 }
 0x1ef   :  { %656 = vmatmul.mubr.bf16.vlgmr.msra.gmra.mxu0 %v388_v56 }
 0x2af   :  { %v494_v58 = vpop.f32.mrf.mxu0 }
 0x2b0   :  { %v495_v59 = vadd.f32 %v570_v57, %v494_v58 }
 0x2b1   :  { %v657_v60 = vpop.f32.mrf.mxu0 }
 0x2b2   :  { %501 = vmax.xlane.f32.xlu0 %v495_v59 }
 0x2b3   :  { %v497_v61 = vpop.f32.mrf.mxu0 }
 0x2b4   :  { %v498_v62 = vadd.f32 %v570_v57, %v497_v61 }
 0x2b5   :  { %v658_v63 = vpop.f32.mrf.mxu0 }
 0x2b6   :  { %503 = vmax.xlane.f32.xlu0 %v498_v62 }
 0x33b   :  { %v502_v0 = vpop.xlane.xlu0 %501 }
 0x33c   :  { %v505_v1 = vsub.f32 %v495_v59, %v502_v0 }
 0x33e   :  { %v507_v2 = vmul.f32 1.442695, %v505_v1 }
 0x33f   :  { %v504_v3 = vpop.xlane.xlu0 %503 }
 0x340   :  { %v506_v4 = vsub.f32 %v498_v62, %v504_v3  ;;  %705 = vpow2.f32 %v507_v2 }
 0x342   :  { %v509_v5 = vmul.f32 1.442695, %v506_v4 }
 0x344   :  { %707 = vpow2.f32 %v509_v5 }
 0x34d   :  { %v706_v6 = vpop.eup %705 }
 0x34e   :  { %511 = vadd.xlane.f32.xlu1 %v706_v6 }
 0x351   :  { %v708_v7 = vpop.eup %707 }
 0x352   :  { %513 = vadd.xlane.f32.xlu1 %v708_v7 }
 0x3d7   :  { %v512_v8 = vpop.xlane.xlu1 %511 }
 0x3d8   :  { %709 = vlog2.f32 %v512_v8 }
 0x3db   :  { %v514_v9 = vpop.xlane.xlu1 %513 }
 0x3dc   :  { %711 = vlog2.f32 %v514_v9 }
 0x3e5   :  { %v710_v10 = vpop.eup %709 }
 0x3e6   :  { %v516_v11 = vmul.f32 0.6931472, %v710_v10 }
 0x3e8   :  { %v519_v12 = vsub.f32 %v505_v1, %v516_v11 }
 0x3e9   :  { %v712_v13 = vpop.eup %711 }
 0x3ea   :  { %v518_v14 = vmul.f32 0.6931472, %v712_v13  ;;  %521 = vst [vmem:[#allocation10] sm:$0xff] %v519_v12 }
 0x3ec   :  { %v520_v15 = vsub.f32 %v506_v4, %v518_v14 }
 0x3ee   :  { %522 = vst [vmem:[#allocation10 + $0x8] sm:$0xff] %v520_v15 }
 0x3ef   :  { %804 = shalt.err (!%p801_p10)
}
 0x3f0   :  { %534 = dma.vmem_to_hbm [thread:$0]  %s529_s6, 256, %s936_s7, [#allocation4], %s825_s11, %s825_s11, %s826_s12  }
 0x3f1   :  { %819 = dma.done.wait [#allocation4], 256  }
 0x3f2   :  { %820 = vsyncadd [#allocation4], 4294967040 }
 0x3f3   :  { %538 = vsyncpa [#allocation3], 1 }
 0x3f4   :  { %539 = vsyncpa [#allocation6], 1 }
 0x3f5   :  { %540 = vsyncpa [#allocation9], 1 }
 0x3f6   :  { %541 = vsyncpa [#allocation4], 1 }

</bundles_post_ra>
